<compile_context>
chip_gen: v5e
topology: v5e:2x2
jax: 0.10.0
libtpu: 0.0.40
codegen_flags: <defaults>
</compile_context>

<pallas_src>
import functools
import math

import jax
import jax.numpy as jnp
import numpy as np
from jax.experimental import pallas as pl
from jax.experimental.pallas import tpu as pltpu


def relation_fused_kernel(f_ref, logg_ref, wk_ref, bk_ref, q_ref, v_ref,
                          out_ref, k_scratch):
    """One row tile (block_q query rows), all Nr relation heads.

    f_ref:    (block_q, A)      appearance features for this row tile (f32)
    logg_ref: (Nr, block_q, N)  log(clamp(relu(WG(pos)), 1e-6)) for these rows
    wk_ref:   (A, Nr*K)         stacked WK weights (head-major columns)
    bk_ref:   (1, Nr*K)         stacked WK bias (f32)
    q_ref:    (N, Nr*K)         precomputed Q projection, 1/sqrt(K) folded in
    v_ref:    (N, Nr*K)         precomputed V projection
    out_ref:  (block_q, A)      concat over heads + residual f_a rows
    k_scratch:(block_q, Nr*K)   f32 VMEM scratch for the per-tile K projection
    """
    nr = logg_ref.shape[0]
    nrk = q_ref.shape[-1]
    dim_k = nrk // nr

    # Heads per 128-lane-aligned store group (pairs for K=64, quads for K=32).
    if 128 % dim_k == 0 and nr % (128 // dim_k) == 0:
        hpg = 128 // dim_k
    else:
        hpg = 1

    f = f_ref[...]                                  # (block_q, A), f32 residual
    fm = f.astype(wk_ref.dtype)

    # Per-tile K projection for every head: one lane-dense MXU matmul.
    k_scratch[...] = (
        jnp.dot(fm, wk_ref[...], preferred_element_type=jnp.float32)
        + bk_ref[...])

    for g in range(nr // hpg):
        group_outs = []
        for hh in range(hpg):
            h = g * hpg + hh
            lo, hi = h * dim_k, (h + 1) * dim_k
            k_h = k_scratch[:, lo:hi].astype(q_ref.dtype)    # (block_q, K)
            q_h = q_ref[:, lo:hi]                            # (N, K)
            v_h = v_ref[:, lo:hi]                            # (N, K)

            # scores[i, j] = <k_i, q_j/sqrt(K)>  (scale folded into WQ).
            scores = jax.lax.dot_general(
                k_h, q_h, (((1,), (1,)), ((), ())),
                preferred_element_type=jnp.float32)          # (block_q, N)

            # w_mn = softmax_j( log(clamp(relu(WG(pos)),1e-6)) + scores )
            logits = logg_ref[h].astype(jnp.float32) + scores
            m = jnp.max(logits, axis=1, keepdims=True)
            e = jnp.exp(logits - m)
            denom = jnp.sum(e, axis=1, keepdims=True)
            p = e * pl.reciprocal(denom, approx=True)        # EUP slot

            group_outs.append(
                jnp.dot(p.astype(v_ref.dtype), v_h,
                        preferred_element_type=jnp.float32))  # (block_q, K)

        # Fused residual + direct, lane-aligned store of this head group.
        glo, ghi = g * hpg * dim_k, (g + 1) * hpg * dim_k
        block = group_outs[0] if hpg == 1 else jnp.concatenate(group_outs, -1)
        out_ref[:, glo:ghi] = (block + f[:, glo:ghi]).astype(out_ref.dtype)


def relation_module(f_a, pos_emb, params, *, block_q=None,
                    compute_dtype=jnp.float32):
    """Pallas implementation of RelationModule.forward (all heads fused).

    compute_dtype: dtype used for log_g storage and MXU operands (WK/Q/V).
      jnp.bfloat16 halves the dominant HBM stream and uses the bf16 MXU path
      on v5e/v6e/v7x; the demo uses f32 so the f32-reference check stays tight.
    """
    N, A = f_a.shape
    Nr, _, K = params["wkw"].shape
    G = params["wgw"].shape[-1]
    assert Nr * K == A, "residual add requires n_relations * key_dim == appearance_dim"
    nrk = Nr * K
    cdt = jnp.dtype(compute_dtype)

    # --- WG geometry projection, all heads at once (plain XLA, (N*N,G)@(G,Nr)) ---
    pos_flat = pos_emb.reshape(N * N, G)
    wg_w = jnp.transpose(params["wgw"][:, 0, :])            # (G, Nr)
    wg_b = params["wgb"][:, 0, 0]                           # (Nr,)
    g = jnp.maximum(pos_flat @ wg_w + wg_b, 0.0)            # relu(WG(pos))
    log_g = jnp.log(jnp.maximum(g, 1e-6))
    log_g = jnp.transpose(log_g).reshape(Nr, N, N).astype(cdt)   # head-major bias

    # --- stack per-head weights head-major; fold 1/sqrt(K) into WQ ---
    def stack_w(w):   # (Nr, A, K) -> (A, Nr*K)
        return jnp.transpose(w, (1, 0, 2)).reshape(A, nrk)

    def stack_b(b):   # (Nr, 1, K) -> (1, Nr*K)
        return b[:, 0, :].reshape(1, nrk)

    inv_sqrt_k = 1.0 / math.sqrt(K)
    wk = stack_w(params["wkw"]).astype(cdt)
    bk = stack_b(params["wkb"]).astype(jnp.float32)
    wq = stack_w(params["wqw"]) * inv_sqrt_k
    bq = stack_b(params["wqb"]) * inv_sqrt_k
    wv = stack_w(params["wvw"])
    bv = stack_b(params["wvb"])

    # --- Q_all / V_all computed ONCE (every row tile needs all N rows) ---
    qv = jnp.dot(f_a, jnp.concatenate([wq, wv], axis=-1)) \
        + jnp.concatenate([bq, bv], axis=-1)                 # (N, 2*Nr*K)
    q_all = qv[:, :nrk].astype(cdt)
    v_all = qv[:, nrk:].astype(cdt)

    # --- row-tile grid over the query/output axis ---
    if block_q is None:
        block_q = min(128, N)
    block_q = min(block_q, N)
    grid = (pl.cdiv(N, block_q),)

    itemsize = cdt.itemsize
    resident_bytes = (A * nrk + 2 * N * nrk) * itemsize + nrk * 4
    per_tile_bytes = (2 * block_q * A * 4                # f tile + out tile (f32)
                      + Nr * block_q * N * itemsize      # log_g tile
                      + block_q * nrk * 4)               # k scratch
    vmem_limit = int(min(64 * 2**20,
                         max(resident_bytes + 3 * per_tile_bytes + (4 << 20),
                             16 * 2**20)))

    flops = (2 * N * A * nrk                  # K projection
             + 2 * 2 * N * N * nrk            # QK^T + PV
             + 6 * Nr * N * N)                # softmax / adds
    cost = pl.CostEstimate(
        flops=int(flops),
        transcendentals=int(Nr * N * N + N),
        bytes_accessed=int(N * A * 4 + Nr * N * N * itemsize
                           + (A + 2 * N) * nrk * itemsize + nrk * 4
                           + N * A * 4))

    return pl.pallas_call(
        relation_fused_kernel,
        out_shape=jax.ShapeDtypeStruct((N, A), f_a.dtype),
        grid_spec=pltpu.PrefetchScalarGridSpec(
            num_scalar_prefetch=0,
            grid=grid,
            in_specs=[
                pl.BlockSpec((block_q, A), lambda i: (i, 0)),        # f rows
                pl.BlockSpec((Nr, block_q, N), lambda i: (0, i, 0)),  # log_g rows
                pl.BlockSpec((A, nrk), lambda i: (0, 0)),             # WK (resident)
                pl.BlockSpec((1, nrk), lambda i: (0, 0)),             # bK (resident)
                pl.BlockSpec((N, nrk), lambda i: (0, 0)),             # Q_all (resident)
                pl.BlockSpec((N, nrk), lambda i: (0, 0)),             # V_all (resident)
            ],
            out_specs=pl.BlockSpec((block_q, A), lambda i: (i, 0)),
            scratch_shapes=[pltpu.VMEM((block_q, nrk), jnp.float32)],
        ),
        compiler_params=pltpu.CompilerParams(
            dimension_semantics=("parallel",),
            vmem_limit_bytes=vmem_limit),
        cost_estimate=cost,
    )(f_a, log_g, wk, bk, q_all, v_all)


def relation_module_reference(f_a, pos_emb, params):
    """Pure-JAX reference matching the PyTorch forward exactly."""
    N, A = f_a.shape
    Nr, _, K = params["wkb"].shape
    pos_flat = pos_emb.reshape(N * N, -1)
    outs = []
    for r in range(Nr):
        wg = jnp.maximum(
            pos_flat @ params["wgw"][r, 0][:, None] + params["wgb"][r, 0, 0], 0.0)
        k = f_a @ params["wkw"][r] + params["wkb"][r]
        q = f_a @ params["wqw"][r] + params["wqb"][r]
        v = f_a @ params["wvw"][r] + params["wvb"][r]
        # einsum('nk,mk->nm') == sum(w_k[:,None,:] * w_q[None,:,:], -1)
        scaled = jnp.einsum("nk,mk->nm", k, q) / np.sqrt(K)
        w_mn = jnp.log(jnp.maximum(wg.reshape(N, N), 1e-6)) + scaled
        w_mn = jax.nn.softmax(w_mn, axis=1)
        outs.append(w_mn @ v)
    return jnp.concatenate(outs, axis=-1) + f_a


if __name__ == "__main__":
    # Small, consistent shapes: Nr * key_dim must equal appearance_dim for the
    # residual add (as in the PyTorch defaults 16 * 64 == 1024).
    N, A, K, G, Nr = 16, 128, 32, 16, 4

    key = jax.random.PRNGKey(0)
    keys = jax.random.split(key, 10)
    f_a = jax.random.normal(keys[0], (N, A), jnp.float32)
    pos_emb = jax.random.uniform(keys[1], (N, N, G), jnp.float32)

    scale = 0.1
    params = {
        "wgw": jax.random.normal(keys[2], (Nr, 1, G), jnp.float32) * scale,
        "wgb": jax.random.normal(keys[3], (Nr, 1, 1), jnp.float32) * scale,
        "wkw": jax.random.normal(keys[4], (Nr, A, K), jnp.float32) * scale,
        "wkb": jax.random.normal(keys[5], (Nr, 1, K), jnp.float32) * scale,
        "wqw": jax.random.normal(keys[6], (Nr, A, K), jnp.float32) * scale,
        "wqb": jax.random.normal(keys[7], (Nr, 1, K), jnp.float32) * scale,
        "wvw": jax.random.normal(keys[8], (Nr, A, K), jnp.float32) * scale,
        "wvb": jax.random.normal(keys[9], (Nr, 1, K), jnp.float32) * scale,
    }

    # block_q=8 exercises a real 2-step "parallel" row-tile grid at this demo N.
    run = jax.jit(functools.partial(relation_module, block_q=8,
                                    compute_dtype=jnp.float32))
    out = jax.block_until_ready(run(f_a, pos_emb, params))

    ref = relation_module_reference(f_a, pos_emb, params)
    # Tolerance covers MXU-vs-XLA f32 matmul rounding (scores feed an exp);
    # bf16 compute_dtype would need a looser bound (see review notes).
    np.testing.assert_allclose(np.asarray(out), np.asarray(ref),
                               rtol=2e-2, atol=2e-2)
    print("KERNEL_OK")
</pallas_src>

<mosaic_0001>
module attributes {stable_mosaic.version = 11 : i64} {
  func.func @relation_fused_kernel(%arg0: i32, %arg1: memref<8x128xf32, #tpu.memory_space<vmem>>, %arg2: memref<4x8x16xf32, #tpu.memory_space<vmem>>, %arg3: memref<128x128xf32, #tpu.memory_space<vmem>>, %arg4: memref<1x128xf32, #tpu.memory_space<vmem>>, %arg5: memref<16x128xf32, #tpu.memory_space<vmem>>, %arg6: memref<16x128xf32, #tpu.memory_space<vmem>>, %arg7: memref<8x128xf32, #tpu.memory_space<vmem>>, %arg8: memref<8x128xf32, #tpu.memory_space<vmem>>) attributes {dimension_semantics = [#tpu.dimension_semantics<parallel>], iteration_bounds = array<i64: 2>, scalar_prefetch = 0 : i64, scratch_operands = 1 : i64, tpu.core_type = #tpu.core_type<tc>, window_params = [{transform_indices = @transform_0, window_bounds = array<i64: 8, 128>}, {transform_indices = @transform_1, window_bounds = array<i64: 4, 8, 16>}, {pipeline_mode = #tpu.pipeline_mode<synchronous>, transform_indices = @transform_2, window_bounds = array<i64: 128, 128>}, {pipeline_mode = #tpu.pipeline_mode<synchronous>, transform_indices = @transform_3, window_bounds = array<i64: 1, 128>}, {pipeline_mode = #tpu.pipeline_mode<synchronous>, transform_indices = @transform_4, window_bounds = array<i64: 16, 128>}, {pipeline_mode = #tpu.pipeline_mode<synchronous>, transform_indices = @transform_5, window_bounds = array<i64: 16, 128>}, {transform_indices = @transform_6, window_bounds = array<i64: 8, 128>}]} {
    %c0 = arith.constant 0 : index
    %c0_0 = arith.constant 0 : index
    %0 = vector.load %arg1[%c0, %c0_0] : memref<8x128xf32, #tpu.memory_space<vmem>>, vector<8x128xf32>
    %c0_1 = arith.constant 0 : index
    %c0_2 = arith.constant 0 : index
    %1 = vector.load %arg3[%c0_1, %c0_2] : memref<128x128xf32, #tpu.memory_space<vmem>>, vector<128x128xf32>
    %cst = arith.constant dense<0.000000e+00> : vector<8x128xf32>
    %2 = tpu.matmul %0, %1, %cst {dimension_numbers = #tpu.dot_dimension_numbers<[1], [0], [0], [1], [0, 0, 1, 1], [], []>} : vector<8x128xf32>, vector<128x128xf32>, vector<8x128xf32> -> vector<8x128xf32>
    %c0_3 = arith.constant 0 : index
    %c0_4 = arith.constant 0 : index
    %3 = vector.load %arg4[%c0_3, %c0_4] : memref<1x128xf32, #tpu.memory_space<vmem>>, vector<1x128xf32>
    %4 = vector.broadcast %3 : vector<1x128xf32> to vector<8x128xf32>
    %5 = arith.addf %2, %4 : vector<8x128xf32>
    %c0_5 = arith.constant 0 : index
    %c0_6 = arith.constant 0 : index
    %6 = vector.load %arg8[%c0_5, %c0_6] : memref<8x128xf32, #tpu.memory_space<vmem>>, vector<8x128xf32>
    tpu.vector_store %arg8[%c0_5, %c0_6], %5 {strides = array<i32>} : memref<8x128xf32, #tpu.memory_space<vmem>>, vector<8x128xf32>,
    %c0_7 = arith.constant 0 : index
    %c0_8 = arith.constant 0 : index
    %7 = vector.load %arg8[%c0_7, %c0_8] : memref<8x128xf32, #tpu.memory_space<vmem>>, vector<8x32xf32>
    %c0_9 = arith.constant 0 : index
    %c0_10 = arith.constant 0 : index
    %8 = vector.load %arg5[%c0_9, %c0_10] : memref<16x128xf32, #tpu.memory_space<vmem>>, vector<16x32xf32>
    %c0_11 = arith.constant 0 : index
    %c0_12 = arith.constant 0 : index
    %9 = vector.load %arg6[%c0_11, %c0_12] : memref<16x128xf32, #tpu.memory_space<vmem>>, vector<16x32xf32>
    %cst_13 = arith.constant dense<0.000000e+00> : vector<8x16xf32>
    %10 = tpu.matmul %7, %8, %cst_13 {dimension_numbers = #tpu.dot_dimension_numbers<[1], [1], [0], [0], [0, 0, 1, 0], [], []>} : vector<8x32xf32>, vector<16x32xf32>, vector<8x16xf32> -> vector<8x16xf32>
    %c0_14 = arith.constant 0 : index
    %c0_15 = arith.constant 0 : index
    %c0_16 = arith.constant 0 : index
    %11 = vector.load %arg2[%c0_14, %c0_15, %c0_16] : memref<4x8x16xf32, #tpu.memory_space<vmem>>, vector<1x8x16xf32>
    %12 = vector.shape_cast %11 : vector<1x8x16xf32> to vector<8x16xf32>
    %13 = arith.addf %12, %10 : vector<8x16xf32>
    %cst_17 = arith.constant dense<0xFF800000> : vector<8xf32>
    %14 = vector.multi_reduction <maximumf>, %13, %cst_17 [1] : vector<8x16xf32> to vector<8xf32>
    %15 = vector.shape_cast %14 : vector<8xf32> to vector<8x1xf32>
    %16 = vector.broadcast %15 : vector<8x1xf32> to vector<8x16xf32>
    %17 = arith.subf %13, %16 : vector<8x16xf32>
    %18 = math.exp %17 : vector<8x16xf32>
    %cst_18 = arith.constant dense<0.000000e+00> : vector<8xf32>
    %19 = vector.multi_reduction <add>, %18, %cst_18 [1] : vector<8x16xf32> to vector<8xf32>
    %20 = vector.shape_cast %19 : vector<8xf32> to vector<8x1xf32>
    %21 = tpu.reciprocal %20 {approx = true} : vector<8x1xf32> -> vector<8x1xf32>
    %22 = vector.broadcast %21 : vector<8x1xf32> to vector<8x16xf32>
    %23 = arith.mulf %18, %22 : vector<8x16xf32>
    %cst_19 = arith.constant dense<0.000000e+00> : vector<8x32xf32>
    %24 = tpu.matmul %23, %9, %cst_19 {dimension_numbers = #tpu.dot_dimension_numbers<[1], [0], [0], [1], [0, 0, 1, 1], [], []>} : vector<8x16xf32>, vector<16x32xf32>, vector<8x32xf32> -> vector<8x32xf32>
    %c0_20 = arith.constant 0 : index
    %c32 = arith.constant 32 : index
    %25 = vector.load %arg8[%c0_20, %c32] : memref<8x128xf32, #tpu.memory_space<vmem>>, vector<8x32xf32>
    %c0_21 = arith.constant 0 : index
    %c32_22 = arith.constant 32 : index
    %26 = vector.load %arg5[%c0_21, %c32_22] : memref<16x128xf32, #tpu.memory_space<vmem>>, vector<16x32xf32>
    %c0_23 = arith.constant 0 : index
    %c32_24 = arith.constant 32 : index
    %27 = vector.load %arg6[%c0_23, %c32_24] : memref<16x128xf32, #tpu.memory_space<vmem>>, vector<16x32xf32>
    %cst_25 = arith.constant dense<0.000000e+00> : vector<8x16xf32>
    %28 = tpu.matmul %25, %26, %cst_25 {dimension_numbers = #tpu.dot_dimension_numbers<[1], [1], [0], [0], [0, 0, 1, 0], [], []>} : vector<8x32xf32>, vector<16x32xf32>, vector<8x16xf32> -> vector<8x16xf32>
    %c1 = arith.constant 1 : index
    %c0_26 = arith.constant 0 : index
    %c0_27 = arith.constant 0 : index
    %29 = vector.load %arg2[%c1, %c0_26, %c0_27] : memref<4x8x16xf32, #tpu.memory_space<vmem>>, vector<1x8x16xf32>
    %30 = vector.shape_cast %29 : vector<1x8x16xf32> to vector<8x16xf32>
    %31 = arith.addf %30, %28 : vector<8x16xf32>
    %cst_28 = arith.constant dense<0xFF800000> : vector<8xf32>
    %32 = vector.multi_reduction <maximumf>, %31, %cst_28 [1] : vector<8x16xf32> to vector<8xf32>
    %33 = vector.shape_cast %32 : vector<8xf32> to vector<8x1xf32>
    %34 = vector.broadcast %33 : vector<8x1xf32> to vector<8x16xf32>
    %35 = arith.subf %31, %34 : vector<8x16xf32>
    %36 = math.exp %35 : vector<8x16xf32>
    %cst_29 = arith.constant dense<0.000000e+00> : vector<8xf32>
    %37 = vector.multi_reduction <add>, %36, %cst_29 [1] : vector<8x16xf32> to vector<8xf32>
    %38 = vector.shape_cast %37 : vector<8xf32> to vector<8x1xf32>
    %39 = tpu.reciprocal %38 {approx = true} : vector<8x1xf32> -> vector<8x1xf32>
    %40 = vector.broadcast %39 : vector<8x1xf32> to vector<8x16xf32>
    %41 = arith.mulf %36, %40 : vector<8x16xf32>
    %cst_30 = arith.constant dense<0.000000e+00> : vector<8x32xf32>
    %42 = tpu.matmul %41, %27, %cst_30 {dimension_numbers = #tpu.dot_dimension_numbers<[1], [0], [0], [1], [0, 0, 1, 1], [], []>} : vector<8x16xf32>, vector<16x32xf32>, vector<8x32xf32> -> vector<8x32xf32>
    %c0_31 = arith.constant 0 : index
    %c64 = arith.constant 64 : index
    %43 = vector.load %arg8[%c0_31, %c64] : memref<8x128xf32, #tpu.memory_space<vmem>>, vector<8x32xf32>
    %c0_32 = arith.constant 0 : index
    %c64_33 = arith.constant 64 : index
    %44 = vector.load %arg5[%c0_32, %c64_33] : memref<16x128xf32, #tpu.memory_space<vmem>>, vector<16x32xf32>
    %c0_34 = arith.constant 0 : index
    %c64_35 = arith.constant 64 : index
    %45 = vector.load %arg6[%c0_34, %c64_35] : memref<16x128xf32, #tpu.memory_space<vmem>>, vector<16x32xf32>
    %cst_36 = arith.constant dense<0.000000e+00> : vector<8x16xf32>
    %46 = tpu.matmul %43, %44, %cst_36 {dimension_numbers = #tpu.dot_dimension_numbers<[1], [1], [0], [0], [0, 0, 1, 0], [], []>} : vector<8x32xf32>, vector<16x32xf32>, vector<8x16xf32> -> vector<8x16xf32>
    %c2 = arith.constant 2 : index
    %c0_37 = arith.constant 0 : index
    %c0_38 = arith.constant 0 : index
    %47 = vector.load %arg2[%c2, %c0_37, %c0_38] : memref<4x8x16xf32, #tpu.memory_space<vmem>>, vector<1x8x16xf32>
    %48 = vector.shape_cast %47 : vector<1x8x16xf32> to vector<8x16xf32>
    %49 = arith.addf %48, %46 : vector<8x16xf32>
    %cst_39 = arith.constant dense<0xFF800000> : vector<8xf32>
    %50 = vector.multi_reduction <maximumf>, %49, %cst_39 [1] : vector<8x16xf32> to vector<8xf32>
    %51 = vector.shape_cast %50 : vector<8xf32> to vector<8x1xf32>
    %52 = vector.broadcast %51 : vector<8x1xf32> to vector<8x16xf32>
    %53 = arith.subf %49, %52 : vector<8x16xf32>
    %54 = math.exp %53 : vector<8x16xf32>
    %cst_40 = arith.constant dense<0.000000e+00> : vector<8xf32>
    %55 = vector.multi_reduction <add>, %54, %cst_40 [1] : vector<8x16xf32> to vector<8xf32>
    %56 = vector.shape_cast %55 : vector<8xf32> to vector<8x1xf32>
    %57 = tpu.reciprocal %56 {approx = true} : vector<8x1xf32> -> vector<8x1xf32>
    %58 = vector.broadcast %57 : vector<8x1xf32> to vector<8x16xf32>
    %59 = arith.mulf %54, %58 : vector<8x16xf32>
    %cst_41 = arith.constant dense<0.000000e+00> : vector<8x32xf32>
    %60 = tpu.matmul %59, %45, %cst_41 {dimension_numbers = #tpu.dot_dimension_numbers<[1], [0], [0], [1], [0, 0, 1, 1], [], []>} : vector<8x16xf32>, vector<16x32xf32>, vector<8x32xf32> -> vector<8x32xf32>
    %c0_42 = arith.constant 0 : index
    %c96 = arith.constant 96 : index
    %61 = vector.load %arg8[%c0_42, %c96] : memref<8x128xf32, #tpu.memory_space<vmem>>, vector<8x32xf32>
    %c0_43 = arith.constant 0 : index
    %c96_44 = arith.constant 96 : index
    %62 = vector.load %arg5[%c0_43, %c96_44] : memref<16x128xf32, #tpu.memory_space<vmem>>, vector<16x32xf32>
    %c0_45 = arith.constant 0 : index
    %c96_46 = arith.constant 96 : index
    %63 = vector.load %arg6[%c0_45, %c96_46] : memref<16x128xf32, #tpu.memory_space<vmem>>, vector<16x32xf32>
    %cst_47 = arith.constant dense<0.000000e+00> : vector<8x16xf32>
    %64 = tpu.matmul %61, %62, %cst_47 {dimension_numbers = #tpu.dot_dimension_numbers<[1], [1], [0], [0], [0, 0, 1, 0], [], []>} : vector<8x32xf32>, vector<16x32xf32>, vector<8x16xf32> -> vector<8x16xf32>
    %c3 = arith.constant 3 : index
    %c0_48 = arith.constant 0 : index
    %c0_49 = arith.constant 0 : index
    %65 = vector.load %arg2[%c3, %c0_48, %c0_49] : memref<4x8x16xf32, #tpu.memory_space<vmem>>, vector<1x8x16xf32>
    %66 = vector.shape_cast %65 : vector<1x8x16xf32> to vector<8x16xf32>
    %67 = arith.addf %66, %64 : vector<8x16xf32>
    %cst_50 = arith.constant dense<0xFF800000> : vector<8xf32>
    %68 = vector.multi_reduction <maximumf>, %67, %cst_50 [1] : vector<8x16xf32> to vector<8xf32>
    %69 = vector.shape_cast %68 : vector<8xf32> to vector<8x1xf32>
    %70 = vector.broadcast %69 : vector<8x1xf32> to vector<8x16xf32>
    %71 = arith.subf %67, %70 : vector<8x16xf32>
    %72 = math.exp %71 : vector<8x16xf32>
    %cst_51 = arith.constant dense<0.000000e+00> : vector<8xf32>
    %73 = vector.multi_reduction <add>, %72, %cst_51 [1] : vector<8x16xf32> to vector<8xf32>
    %74 = vector.shape_cast %73 : vector<8xf32> to vector<8x1xf32>
    %75 = tpu.reciprocal %74 {approx = true} : vector<8x1xf32> -> vector<8x1xf32>
    %76 = vector.broadcast %75 : vector<8x1xf32> to vector<8x16xf32>
    %77 = arith.mulf %72, %76 : vector<8x16xf32>
    %cst_52 = arith.constant dense<0.000000e+00> : vector<8x32xf32>
    %78 = tpu.matmul %77, %63, %cst_52 {dimension_numbers = #tpu.dot_dimension_numbers<[1], [0], [0], [1], [0, 0, 1, 1], [], []>} : vector<8x16xf32>, vector<16x32xf32>, vector<8x32xf32> -> vector<8x32xf32>
    %79 = tpu.concatenate %24, %42, %60, %78 in 1 : vector<8x32xf32>, vector<8x32xf32>, vector<8x32xf32>, vector<8x32xf32> -> vector<8x128xf32>
    %80 = arith.addf %79, %0 : vector<8x128xf32>
    %c0_53 = arith.constant 0 : index
    %c0_54 = arith.constant 0 : index
    %81 = vector.load %arg7[%c0_53, %c0_54] : memref<8x128xf32, #tpu.memory_space<vmem>>, vector<8x128xf32>
    tpu.vector_store %arg7[%c0_53, %c0_54], %80 {strides = array<i32>} : memref<8x128xf32, #tpu.memory_space<vmem>>, vector<8x128xf32>,
    return
  }
  func.func @transform_0(%arg0: i32) -> (i32, i32) {
    %c0_i32 = arith.constant 0 : i32
    %c0_i32_0 = arith.constant 0 : i32
    return %arg0, %c0_i32 : i32, i32
  }
  func.func @transform_1(%arg0: i32) -> (i32, i32, i32) {
    %c0_i32 = arith.constant 0 : i32
    %c0_i32_0 = arith.constant 0 : i32
    %c0_i32_1 = arith.constant 0 : i32
    return %c0_i32, %arg0, %c0_i32_0 : i32, i32, i32
  }
  func.func @transform_2(%arg0: i32) -> (i32, i32) {
    %c0_i32 = arith.constant 0 : i32
    %c0_i32_0 = arith.constant 0 : i32
    %c0_i32_1 = arith.constant 0 : i32
    return %c0_i32, %c0_i32_0 : i32, i32
  }
  func.func @transform_3(%arg0: i32) -> (i32, i32) {
    %c0_i32 = arith.constant 0 : i32
    %c0_i32_0 = arith.constant 0 : i32
    %c0_i32_1 = arith.constant 0 : i32
    return %c0_i32, %c0_i32_0 : i32, i32
  }
  func.func @transform_4(%arg0: i32) -> (i32, i32) {
    %c0_i32 = arith.constant 0 : i32
    %c0_i32_0 = arith.constant 0 : i32
    %c0_i32_1 = arith.constant 0 : i32
    return %c0_i32, %c0_i32_0 : i32, i32
  }
  func.func @transform_5(%arg0: i32) -> (i32, i32) {
    %c0_i32 = arith.constant 0 : i32
    %c0_i32_0 = arith.constant 0 : i32
    %c0_i32_1 = arith.constant 0 : i32
    return %c0_i32, %c0_i32_0 : i32, i32
  }
  func.func @transform_6(%arg0: i32) -> (i32, i32) {
    %c0_i32 = arith.constant 0 : i32
    %c0_i32_0 = arith.constant 0 : i32
    return %arg0, %c0_i32 : i32, i32
  }
}

</mosaic_0001>

<bundles_post_ra>
// kernel: squeeze.7
= control target key start
LH: loop header
LB: loop body
LE: loop exit
PB: predicated region body
PF: predicated region fallthrough
CT: control target
= control target key end

     0   :  { %s37_s8 = smov 32   ;;  %s38_s9 = smov 64   ;;  %vm7_vm0 = vcmask 261120   ;;  %vm13_vm1 = vcmask 1048320   ;;  %vm19_vm2 = vcmask 785920   ;;  %vm25_vm3 = vcmask 523520   ;;  %s55_s0 = inlined_call_operand.vmem [shape: f32[4,32], index: 0, kind: input, shape index: {}]   ;;  %s56_s1 = inlined_call_operand.vmem [shape: f32[1,128], index: 1, kind: output, shape index: {}]  }
   0x1   :  { %v4_v0 = vld [vmem:[%s55_s0] sm:$0xf]  ;;  %s36_s0 = smov 96  }
   0x2   :  { %5 = vst [vmem:[#allocation1] sm:$0xf] %v4_v0 }
   0x9   :  { %v10_v1 = vld [vmem:[#allocation1 + $0x3] sm:$0x1]   ;;  %v22_v2 = vld [vmem:[#allocation1 + $0x1] sm:$0x1]   ;;  %v16_v3 = vld [vmem:[#allocation1 + $0x2] sm:$0x1]  }
   0xa   :  { %11 = vrot.lane.b32.xlu0 %v10_v1, %s36_s0  ;;  %23 = vrot.lane.b32.xlu1 %v22_v2, %s37_s8  ;;  %v6_v4 = vld [vmem:[#allocation1] sm:$0x1]  }
   0xb   :  { %8 = vst.msk [vmem:[#allocation0] sm:$0x1] %vm7_vm0, %v6_v4  }
  0x12   :  { %17 = vrot.lane.b32.xlu0 %v16_v3, %s38_s9 }
  0x7c   :  { %v12_v5 = vpop.permute.xlu0 %11   ;;  %v24_v6 = vpop.permute.xlu1 %23  }
  0x7d   :  { %14 = vst.msk [vmem:[#allocation0] sm:$0x1] %vm13_vm1, %v12_v5  }
  0x84   :  { %v18_v7 = vpop.permute.xlu0 %17  }
  0x85   :  { %20 = vst.msk [vmem:[#allocation0] sm:$0x1] %vm19_vm2, %v18_v7  }
  0x86   :  { %26 = vst.msk [vmem:[#allocation0] sm:$0x1] %vm25_vm3, %v24_v6  }
  0x8d   :  { %v29_v8 = vld [vmem:[#allocation0] sm:$0x1] }
  0x8e   :  { %32 = vst [vmem:[%s56_s1] sm:$0x1] %v29_v8 }

// kernel: relation_module.1
= control target key start
LH: loop header
LB: loop body
LE: loop exit
PB: predicated region body
PF: predicated region fallthrough
CT: control target
= control target key end

     0   :  { %11 = vsyncpa [#allocation5], 0  ;;  %s1199_s0 = inlined_call_operand.vmem [shape: f32[16,128], index: 0, kind: input, shape index: {}]   ;;  %s1200_s1 = inlined_call_operand.vmem [shape: f32[4,16,16], index: 1, kind: input, shape index: {}]   ;;  %s1201_s2 = inlined_call_operand.vmem [shape: f32[128,128], index: 2, kind: input, shape index: {}]   ;;  %s1202_s3 = inlined_call_operand.vmem [shape: f32[1,128], index: 3, kind: input, shape index: {}]   ;;  %s1203_s4 = inlined_call_operand.vmem [shape: f32[16,128], index: 4, kind: input, shape index: {}]   ;;  %s1204_s5 = inlined_call_operand.vmem [shape: f32[16,128], index: 5, kind: input, shape index: {}]   ;;  %s1205_s6 = inlined_call_operand.hbm [shape: f32[16,128], index: 6, kind: output, shape index: {}]  }
   0x1   :  { %13 = vsyncpa [#allocation5 + $0x1], 0  ;;  %s975_s21 = smov 0   ;;  %s977_s22 = smov 0  }
   0x2   :  { %s979_s23 = smov 0   ;;  %s981_s24 = smov 0  }
   0x3 LB: > { %s996_s25 = sadd.s32 4294967295, %s935_s24   ;;  %s767_s26 = sadd.s32 4294967294, %s935_s24   ;;  %s935_s24 = sphi %s981_s24, %s1211_s24   ;;  %s931_s23 = sphi %s979_s23, %s1210_s23   ;;  %s927_s22 = sphi %s977_s22, %s1209_s22   ;;  %s923_s21 = sphi %s975_s21, %s1208_s21  }
   0x4   : > { %s1000_s27 = sadd.s32 1, %s935_s24   ;;  %s52_s28 = sadd.s32 1, %s931_s23 }
   0x5   : > { %s49_s29 = ssub.s32 %s935_s24, %s1000_s27  ;;  %p59_p0 = scmp.ne.s32.totalorder %s931_s23, %s927_s22 }
   0x6   : > { %p50_p1 = scmp.eq.s32.totalorder %s49_s29, 0  ;;  %p60_p2 = scmp.eq.s32.totalorder %s935_s24, 0 }
   0x7   : > { %p173_p3 = scmp.eq.s32.totalorder %s996_s25, 1  ;;  %p178_p4 = scmp.ne.s32.totalorder %s927_s22, %s923_s21 }
   0x8   : > { %s1012_s30 = scalar_select %p50_p1, %s931_s23, %s52_s28  }
   0x9   : > { %p61_p5 = por %p60_p2, %p59_p0  ;;  %p1014_p6 = por %p173_p3, %p59_p0 }
   0xa   : > { %p179_p7 = scmp.eq.s32.totalorder %s767_s26, 1  ;;  %p769_p9 = scmp.ge.s32.totalorder %s935_s24, 2 }
   0xc   : > { %p1018_p8 = por %p179_p7, %p178_p4  ;;  %207 = sbr.rel (%p769_p9) target bundleno = 25 (0x19), region = 32 }
  0x11   : > { %217 = sbr.rel (!%p61_p5) target bundleno = 25 (0x19), region = 40  ;;  %s219_s9 = sand.u32 (%p61_p5), 1, %s931_s23  }
  0x12   : > { %s771_s10 = sshll.u32 (%p61_p5), %s935_s24, 3  ;;  %s770_s11 = sshll.u32 (%p61_p5), %s219_s9, 5 }
  0x13   : > { %s223_s14 = scalar_lea.vmem (%p61_p5), %s1200_s1, %s771_s10  ;;  %s221_s15 = scalar_lea.vmem (%p61_p5), [#allocation3], %s770_s11 }
  0x14   : > { %v258_v0 = vld [vmem:[%s223_s14] sm:$0xff] (%p61_p5)  ;;  %v260_v1 = vld [vmem:[%s223_s14 + $0x10] sm:$0xff] (%p61_p5) }
  0x15   : > { %v262_v2 = vld [vmem:[%s223_s14 + $0x20] sm:$0xff] (%p61_p5)  ;;  %259 = vst [vmem:[%s221_s15] sm:$0xff] (%p61_p5), %v258_v0  ;;  %v264_v3 = vld [vmem:[%s223_s14 + $0x30] sm:$0xff] (%p61_p5) }
  0x16   : > { %261 = vst [vmem:[%s221_s15 + $0x8] sm:$0xff] %v260_v1 }
  0x17   : > { %263 = vst [vmem:[%s221_s15 + $0x10] sm:$0xff] %v262_v2 }
  0x18   : > { %265 = vst [vmem:[%s221_s15 + $0x18] sm:$0xff] %v264_v3 }
  0x19 PF: > { %p772_p10 = scmp.ge.s32.totalorder %s935_s24, 1  ;;  %p270_p11 = scmp.lt.s32.totalorder %s935_s24, 3 }
  0x1b   : > { %p271_p12 = pnand %p772_p10, %p270_p11 }
  0x1c   : > { %s937_s13 = smov (!%p271_p12), 96   ;;  %p310_p13 = scmp.lt.s32.totalorder (!%p271_p12), %s996_s25, 1 }
  0x1d   : > { %274 = sbr.rel (%p271_p12) target bundleno = 1351 (0x547), region = 78  ;;  %s938_s26 = smov (!%p271_p12), 64  }
  0x1e   : > { %s1121_s28 = sand.u32 (!%p271_p12), 1, %s927_s22   ;;  %s939_s29 = smov (!%p271_p12), 32  }
  0x1f   : > { %s773_s9 = sshll.u32 (!%p271_p12), %s1121_s28, 5  ;;  %s796_s12 = sshll.u32 (!%p271_p12), %s996_s25, 3 }
  0x20   : > { %s1126_s10 = scalar_lea.vmem (!%p271_p12), [#allocation3], %s773_s9  ;;  %s685_s16 = scalar_lea.hbm (!%p271_p12), %s1205_s6, %s796_s12 }
  0x21   : > { %s893_s9 = scalar_lea.hbm (!%p271_p12), %s1205_s6, 16 }
  0x22   : > { %v330_v4 = vld [vmem:[%s1201_s2 + $0x78] sm:$0xff]  ;;  %v329_v5 = vld [vmem:[%s1201_s2 + $0x70] sm:$0xff]  ;;  %v328_v6 = vld [vmem:[%s1201_s2 + $0x68] sm:$0xff]  ;;  %vm361_vm0 = vcmask 261120   ;;  %s311_s14 = scalar_select %p310_p13, %s996_s25, 1  ;;  %vm393_vm1 = vcmask 130048  }
  0x23   : > { %335 = vmatpush.msra.mxu0 %v330_v4  ;;  %v327_v7 = vld [vmem:[%s1201_s2 + $0x60] sm:$0xff]  ;;  %v358_v8 = vld [vmem:[%s1203_s4 + $0x8] sm:$0xff]  ;;  %v326_v9 = vld [vmem:[%s1201_s2 + $0x58] sm:$0xff]  ;;  %vm668_vm2 = vcmask 523264   ;;  %vm670_vm3 = vcmask 785408   ;;  %s675_s25 = scalar_lea.sflag [#allocation5], %s1121_s28 }
  0x24   : > { %432 = vrot.lane.b32.xlu0 %v358_v8, %s937_s13  ;;  %776 = vmatpush.xpose.msk.msra.mxu1 %vm361_vm0, %v358_v8  ;;  %v1055_v10 = vld [vmem:[%s1203_s4] sm:$0xff]  ;;  %v325_v11 = vld [vmem:[%s1201_s2 + $0x50] sm:$0xff]  ;;  %v324_v12 = vld [vmem:[%s1201_s2 + $0x48] sm:$0xff]  ;;  %s775_s19 = sshll.u32 %s311_s14, 3 }
  0x25   : > { %336 = vmatpush.msra.mxu0 %v329_v5  ;;  %v323_v13 = vld [vmem:[%s1201_s2 + $0x40] sm:$0xff]  ;;  %v322_v14 = vld [vmem:[%s1201_s2 + $0x38] sm:$0xff]  ;;  %v321_v15 = vld [vmem:[%s1201_s2 + $0x30] sm:$0xff]  ;;  %s313_s11 = scalar_lea.vmem %s1199_s0, %s775_s19  ;;  %s689_s19 = sshll.u32 %s685_s16, 4  ;;  %s690_s19 = int_to_ptr.hbm [resolvable:$true] %s689_s19 }
  0x26   : > { %v320_v16 = vld [vmem:[%s1201_s2 + $0x28] sm:$0xff]  ;;  %v319_v17 = vld [vmem:[%s1201_s2 + $0x20] sm:$0xff]  ;;  %v318_v18 = vld [vmem:[%s1201_s2 + $0x18] sm:$0xff] }
  0x27   : > { %337 = vmatpush.msra.mxu0 %v328_v6  ;;  %v317_v19 = vld [vmem:[%s1201_s2 + $0x10] sm:$0xff]  ;;  %v316_v20 = vld [vmem:[%s1201_s2 + $0x8] sm:$0xff]  ;;  %v315_v21 = vld [vmem:[%s1201_s2] sm:$0xff] }
  0x28   : > { %777 = vmatpush.xpose.msk.msra.mxu1 %vm361_vm0, %v1055_v10  ;;  %v1099_v22 = vld [vmem:[%s313_s11] sm:$0xff]  ;;  %v360_v29 = vld [vmem:[%s1204_s5 + $0x8] sm:$0xff]  ;;  %v788_v3 = vld [vmem:[%s1126_s10 + $0x10] sm:$0xff]  ;;  %s774_s11 = sshll.u32 %s1121_s28, 3 }
  0x29   : > { %338 = vmatpush.msra.mxu0 %v327_v7  ;;  %v856_v25 = vld [vmem:[%s1202_s3] ss:$0 sm:$0xff]  ;;  %422 = vmatpush.msra.mxu2 %v360_v29  ;;  %v783_v39 = vld [vmem:[%s1126_s10 + $0x8] sm:$0xff]  ;;  %v793_v6 = vld [vmem:[%s1126_s10 + $0x18] sm:$0xff]  ;;  %s309_s17 = scalar_lea.vmem [#allocation4], %s774_s11 }
  0x2a   : > { %v359_v28 = vld [vmem:[%s1204_s5] sm:$0xff]  ;;  %s687_s18 = sshll.u32 %s309_s17, 4  ;;  %s688_s18 = int_to_ptr.vmem [resolvable:$true] %s687_s18 }
  0x2b   : > { %339 = vmatpush.msra.mxu0 %v326_v9  ;;  %v1115_v30 = vpack.i.bf16 %v359_v28, %v360_v29  ;;  %423 = vmatpush.msra.mxu2 %v359_v28  ;;  %v391_v32 = vld [vmem:[%s1126_s10] sm:$0xff] }
  0x2c   : > { %430 = vrot.lane.b32.xlu0 %v1055_v10, %s937_s13 }
  0x2d   : > { %340 = vmatpush.msra.mxu0 %v325_v11  ;;  %842 = vrot.lane.b32.xlu2 %v1115_v30, %s937_s13 }
  0x2f   : > { %341 = vmatpush.msra.mxu0 %v324_v12 }
  0x31   : > { %342 = vmatpush.msra.mxu0 %v323_v13 }
  0x33   : > { %343 = vmatpush.msra.mxu0 %v322_v14 }
  0x35   : > { %344 = vmatpush.msra.mxu0 %v321_v15  ;;  %509 = vrot.lane.b32.xlu2 %v358_v8, %s938_s26 }
  0x37   : > { %345 = vmatpush.msra.mxu0 %v320_v16 }
  0x39   : > { %346 = vmatpush.msra.mxu0 %v319_v17 }
  0x3b   : > { %347 = vmatpush.msra.mxu0 %v318_v18 }
  0x3d   : > { %348 = vmatpush.msra.mxu0 %v317_v19  ;;  %584 = vrot.lane.b32.xlu2 %v358_v8, %s939_s29 }
  0x3f   : > { %349 = vmatpush.msra.mxu0 %v316_v20 }
  0x41   : > { %350 = vmatpush.msra.mxu0 %v315_v21 }
  0x42   : > { %351 = vmatmul.f32.vlgmr.msra.gmra.mxu0 %v1099_v22 }
  0x87   : > { %v843_v36 = vpop.permute.xlu2 %842 }
  0x88   : > { %v844_v37 = vunpack.i.l.bf16 %v843_v36  ;;  %v845_v38 = vunpack.i.h.bf16 %v843_v36 }
  0x8a   : > { %499 = vmatpush.msrb.mxu2 %v844_v37 }
  0x8c   : > { %500 = vmatpush.msrb.mxu2 %v845_v38 }
  0x8f   : > { %v510_v43 = vpop.permute.xlu2 %509 }
  0x90   : > { %785 = vmatpush.xpose.msk.msrb.mxu1 %vm361_vm0, %v510_v43 }
  0x96   : > { %v433_v23 = vpop.permute.xlu0 %432 }
  0x97   : > { %780 = vmatpush.xpose.msk.msra.mxu3 %vm361_vm0, %v433_v23  ;;  %v585_v49 = vpop.permute.xlu2 %584 }
  0x9e   : > { %v431_v24 = vpop.permute.xlu0 %430 }
  0x9f   : > { %781 = vmatpush.xpose.msk.msra.mxu3 %vm361_vm0, %v431_v24 }
  0xbf   : > { %v352_v26 = vpop.f32.mrf.mxu0 }
  0xc0   : > { %v353_v27 = vadd.f32 %v856_v25, %v352_v26 }
  0xc2   : > { %428 = vrot.lane.b32.xlu1 %v353_v27, %s937_s13  ;;  %778 = vmatmul.msk.f32.vlgmr.msra.gmra.mxu1 %vm361_vm0, %v353_v27 }
 0x134   : > { %v429_v31 = vpop.permute.xlu1 %428 }
 0x135   : > { %782 = vmatmul.msk.f32.vlgmr.msra.gmra.mxu3 %vm361_vm0, %v429_v31 }
 0x13f   : > { %v388_v33 = vpop.f32.mrf.mxu1 }
 0x140   : > { %v392_v34 = vadd.f32 %v391_v32, %v388_v33 }
 0x142   : > { %v394_v35 = vsel %vm393_vm1, %v392_v34, -inf }
 0x143   : > { %395 = vmax.xlane.f32.xlu1 %v394_v35 }
 0x15c   : > { %507 = vrot.lane.b32.xlu1 %v1055_v10, %s938_s26 }
 0x1b6   : > { %v396_v44 = vpop.xlane.xlu1 %395 }
 0x1b7   : > { %v397_v45 = vsub.f32 %v392_v34, %v396_v44 }
 0x1b8   : > { %v457_v40 = vpop.f32.mrf.mxu3 }
 0x1b9   : > { %v462_v41 = vadd.f32 %v783_v39, %v457_v40  ;;  %v398_v46 = vmul.f32 1.442695, %v397_v45 }
 0x1bb   : > { %v463_v42 = vsel %vm393_vm1, %v462_v41, -inf  ;;  %857 = vpow2.f32 %v398_v46 }
 0x1bc   : > { %464 = vmax.xlane.f32.xlu2 %v463_v42 }
 0x1c1   : > { %v858_v47 = vpop.eup %857 }
 0x1c2   : > { %v400_v48 = vsel %vm393_vm1, %v858_v47, 0.0 }
 0x1ce   : > { %v508_v59 = vpop.permute.xlu1 %507 }
 0x1cf   : > { %786 = vmatpush.xpose.msk.msrb.mxu1 %vm361_vm0, %v508_v59 }
 0x1d4   : > { %582 = vrot.lane.b32.xlu2 %v1055_v10, %s939_s29 }
 0x1fd   : > { %401 = vadd.xlane.f32.xlu2 %v400_v48 }
 0x215   : > { %580 = vrot.lane.b32.xlu2 %v353_v27, %s939_s29 }
 0x22f   : > { %v465_v50 = vpop.xlane.xlu2 %464 }
 0x230   : > { %v466_v51 = vsub.f32 %v462_v41, %v465_v50 }
 0x232   : > { %v467_v52 = vmul.f32 1.442695, %v466_v51 }
 0x234   : > { %859 = vpow2.f32 %v467_v52 }
 0x237   : > { %v583_v55 = vpop.permute.xlu2 %582 }
 0x23a   : > { %v860_v53 = vpop.eup %859 }
 0x23b   : > { %v469_v54 = vsel %vm393_vm1, %v860_v53, 0.0 }
 0x23c   : > { %470 = vadd.xlane.f32.xlu0 %v469_v54 }
 0x250   : > { %505 = vrot.lane.b32.xlu0 %v353_v27, %s938_s26 }
 0x270   : > { %v402_v56 = vpop.xlane.xlu2 %401 }
 0x271   : > { %861 = vrcp.f32 %v402_v56 }
 0x277   : > { %v862_v57 = vpop.eup %861 }
 0x278   : > { %v404_v58 = vmul.f32 %v862_v57, %v858_v47  ;;  %v581_v63 = vpop.permute.xlu2 %580 }
 0x27a   : > { %779 = vmatmul.msk.f32.vlgmr.msra.gmra.mxu2 %vm393_vm1, %v404_v58 }
 0x27b   : > { %790 = vmatpush.xpose.msk.msra.mxu2 %vm361_vm0, %v585_v49 }
 0x27f   : > { %791 = vmatpush.xpose.msk.msra.mxu2 %vm361_vm0, %v583_v55 }
 0x2af   : > { %v471_v60 = vpop.xlane.xlu0 %470 }
 0x2b0   : > { %863 = vrcp.f32 %v471_v60 }
 0x2b6   : > { %v864_v61 = vpop.eup %863 }
 0x2b7   : > { %v473_v62 = vmul.f32 %v864_v61, %v860_v53 }
 0x2b9   : > { %784 = vmatmul.msk.f32.vlgmr.msrb.gmra.mxu2 %vm393_vm1, %v473_v62 }
 0x2c1   : > { %792 = vmatmul.msk.f32.vlgmr.msra.gmra.mxu2 %vm361_vm0, %v581_v63 }
 0x2c2   : > { %v506_v0 = vpop.permute.xlu0 %505 }
 0x2c3   : > { %787 = vmatmul.msk.f32.vlgmr.msrb.gmra.mxu1 %vm361_vm0, %v506_v0 }
 0x2fd   : > { %v425_v1 = vpop.f32.mrf.mxu2 }
 0x33c   : > { %v502_v2 = vpop.f32.mrf.mxu2 }
 0x340   : > { %v534_v4 = vpop.f32.mrf.mxu1 }
 0x341   : > { %v539_v5 = vadd.f32 %v788_v3, %v534_v4 }
 0x343   : > { %v540_v7 = vsel %vm393_vm1, %v539_v5, -inf }
 0x344   : > { %v609_v8 = vpop.f32.mrf.mxu2  ;;  %541 = vmax.xlane.f32.xlu2 %v540_v7 }
 0x345   : > { %v614_v9 = vadd.f32 %v793_v6, %v609_v8 }
 0x347   : > { %v615_v10 = vsel %vm393_vm1, %v614_v9, -inf }
 0x348   : > { %616 = vmax.xlane.f32.xlu1 %v615_v10 }
 0x35c   : > { %847 = vrot.lane.b32.xlu2 %v1115_v30, %s938_s26 }
 0x3b7   : > { %v542_v11 = vpop.xlane.xlu2 %541 }
 0x3b8   : > { %v543_v12 = vsub.f32 %v539_v5, %v542_v11 }
 0x3ba   : > { %v544_v13 = vmul.f32 1.442695, %v543_v12 }
 0x3bb   : > { %v617_v14 = vpop.xlane.xlu1 %616 }
 0x3bc   : > { %865 = vpow2.f32 %v544_v13  ;;  %v618_v15 = vsub.f32 %v614_v9, %v617_v14 }
 0x3be   : > { %v619_v16 = vmul.f32 1.442695, %v618_v15 }
 0x3bf   : > { %v848_v21 = vpop.permute.xlu2 %847 }
 0x3c0   : > { %867 = vpow2.f32 %v619_v16  ;;  %v849_v23 = vunpack.i.l.bf16 %v848_v21  ;;  %v850_v24 = vunpack.i.h.bf16 %v848_v21 }
 0x3c2   : > { %v866_v17 = vpop.eup %865  ;;  %574 = vmatpush.msrb.mxu3 %v849_v23 }
 0x3c3   : > { %v546_v18 = vsel %vm393_vm1, %v866_v17, 0.0 }
 0x3c4   : > { %547 = vadd.xlane.f32.xlu0 %v546_v18  ;;  %575 = vmatpush.msrb.mxu3 %v850_v24 }
 0x3c6   : > { %v868_v19 = vpop.eup %867 }
 0x3c7   : > { %v621_v20 = vsel %vm393_vm1, %v868_v19, 0.0 }
 0x3c8   : > { %622 = vadd.xlane.f32.xlu1 %v621_v20 }
 0x3d8   : > { %852 = vrot.lane.b32.xlu0 %v1115_v30, %s939_s29 }
 0x3e1   : > { %656 = vrot.lane.b32.xlu1 %v502_v2, %s939_s29 }
 0x437   : > { %v548_v25 = vpop.xlane.xlu0 %547 }
 0x438   : > { %869 = vrcp.f32 %v548_v25 }
 0x43b   : > { %v623_v28 = vpop.xlane.xlu1 %622 }
 0x43c   : > { %871 = vrcp.f32 %v623_v28 }
 0x43e   : > { %v870_v26 = vpop.eup %869 }
 0x43f   : > { %v550_v27 = vmul.f32 %v870_v26, %v866_v17 }
 0x441   : > { %789 = vmatmul.msk.f32.vlgmr.msrb.gmra.mxu3 %vm393_vm1, %v550_v27 }
 0x442   : > { %v872_v31 = vpop.eup %871 }
 0x443   : > { %v625_v33 = vmul.f32 %v872_v31, %v868_v19 }
 0x44a   : > { %v853_v29 = vpop.permute.xlu0 %852 }
 0x44b   : > { %v854_v30 = vunpack.i.l.bf16 %v853_v29  ;;  %v855_v32 = vunpack.i.h.bf16 %v853_v29 }
 0x44d   : > { %649 = vmatpush.msra.mxu1 %v854_v30 }
 0x44f   : > { %650 = vmatpush.msra.mxu1 %v855_v32 }
 0x450   : > { %794 = vmatmul.msk.f32.vlgmr.msra.gmra.mxu1 %vm393_vm1, %v625_v33 }
 0x453   : > { %v657_v36 = vpop.permute.xlu1 %656 }
 0x454   : > { %v667_v38 = vsel %vm361_vm0, %v425_v1, %v657_v36 }
 0x4c4   : > { %v577_v34 = vpop.f32.mrf.mxu3 }
 0x4c5   : > { %660 = vrot.lane.b32.xlu2 %v577_v34, %s938_s26 }
 0x4cd   : > { %v652_v35 = vpop.f32.mrf.mxu1 }
 0x4ce   : > { %664 = vrot.lane.b32.xlu0 %v652_v35, %s937_s13  ;;  %s887_s13 = sshra.s32 %s690_s19, 4  ;;  %s888_s13 = int_to_ptr.hbm [resolvable:$true] %s887_s13 }
 0x4cf   : > { %s889_s20 = scalar_lea.hbm %s888_s13, 8  ;;  %p894_p3 = scmp.lt.s32.totalorder %s888_s13, %s1205_s6 }
 0x4d0   : > { %p890_p0 = scmp.ne.s32.totalorder %s888_s13, %s889_s20  ;;  %p895_p4 = scmp.lt.s32.totalorder %s893_s9, %s889_s20 }
 0x4d2   : > { %p891_p1 = pnand %p890_p0, %p1014_p6  ;;  %p896_p5 = por %p895_p4, %p894_p3 }
 0x4d4   : > { %p892_p2 = pneg %p891_p1 }
 0x4d6   : > { %p897_p7 = pnand %p896_p5, %p892_p2 }
 0x51f   : > { %v661_v37 = vpop.permute.xlu2 %660 }
 0x520   : > { %v669_v39 = vsel %vm668_vm2, %v667_v38, %v661_v37 }
 0x540   : > { %v665_v40 = vpop.permute.xlu0 %664 }
 0x541   : > { %v671_v41 = vsel %vm670_vm3, %v669_v39, %v665_v40 }
 0x542   : > { %v672_v42 = vadd.f32 %v671_v41, %v1099_v22 }
 0x544   : > { %673 = vst [vmem:[%s309_s17] sm:$0xff] %v672_v42 }
 0x545   : > { %900 = shalt.err (!%p897_p7)
}
 0x546   : > { %799 = dma.vmem_to_hbm [thread:$0]  (%p1014_p6), %s688_s18, 128, %s690_s19, %s675_s25  }
 0x547 PF: > { %s701_s28 = sand.u32 1, %s923_s21   ;;  %p802_p10 = pnand %p769_p9, %p1018_p8 }
 0x548   : > { %s702_s12 = scalar_lea.sflag [#allocation5], %s701_s28 }
 0x549   : > { %p803_p11 = pneg %p802_p10 }
 0x54b   : > { %918 = dma.done.wait (%p803_p11), %s702_s12, 128  }
 0x54c   : > { %920 = vsyncadd (%p803_p11), %s702_s12, 4294967168  ;;  %p16_p12 = scmp.ge.s32.totalorder %s1000_s27, 4   ;;  %s1208_s21 = smov %s927_s22 }
 0x54d   : > { %s1209_s22 = smov %s931_s23  ;;  %s1210_s23 = smov %s1012_s30 }
 0x54e   : > { %s1211_s24 = smov %s1000_s27  ;;  %18 = sbr.rel (!%p16_p12) target bundleno = 3 (0x3), region = 128 }
 0x553   :  { %708 = vsyncpa [#allocation5], 1 }
 0x554   :  { %710 = vsyncpa [#allocation5 + $0x1], 1 }

</bundles_post_ra>
